<compile_context>
chip_gen: v5e
topology: v5e:2x2
jax: 0.10.0
libtpu: 0.0.40
codegen_flags: <defaults>
</compile_context>

<pallas_src>
import numpy as np

import jax
import jax.numpy as jnp
from jax.experimental import pallas as pl
from jax.experimental.pallas import tpu as pltpu


# ----------------------------------------------------------------------------
# helpers
# ----------------------------------------------------------------------------
def _round_up(n, m):
    return ((n + m - 1) // m) * m


def _pick_tile(bn):
    """Node tile on the lane axis.

    Padding is only to a 128-lane multiple (never to a large-tile multiple), and the
    tile only grows past 128 when that still leaves >= 8 node blocks so both v7x
    TensorCores keep several blocks each for software pipelining.
    """
    bn_pad = _round_up(max(bn, 1), 128)
    tile = 128
    for cand in (512, 256):
        if bn_pad % cand == 0 and bn_pad // cand >= 8:
            tile = cand
            break
    return tile, bn_pad


# ----------------------------------------------------------------------------
# Fused Pallas kernel: init + (identity forward_step) + pair-softmax attention
# ----------------------------------------------------------------------------
def _segno_fused_kernel(xv_ref, his_ref, wembT_ref, w1hT_ref, pvec_ref, state_ref):
    """One (node-block, frame) grid cell.

    Feature-major layout: node index on the 128-lane axis, features on sublanes.
    `state_ref` is the VMEM-resident accumulator (its BlockSpec ignores the frame
    axis): rows 0:3 = x, 3:6 = v, 6:8 = alignment padding, 8:8+H = h.
    """
    t = pl.program_id(1)
    fin = his_ref.shape[0]

    # packed per-feature parameter vectors, each (H, 1)
    b_emb = pvec_ref[:, 0:1]
    w1s = pvec_ref[:, 1:2]
    b1 = pvec_ref[:, 2:3]
    w2 = pvec_ref[:, 3:4]

    xv_t = xv_ref[...]                       # (6, tile)   current input frame [x|v]
    his_t = his_ref[...]                     # (fin, tile)

    # Embedding of the current frame: K=fin(=4) contraction as unrolled VPU rank-1
    # FMAs (wasteful on the MXU) -> h_emb (H, tile).
    wembT = wembT_ref[...]                   # (H, fin)
    h_emb = b_emb + wembT[:, 0:1] * his_t[0:1, :]
    for k in range(1, fin):
        h_emb = h_emb + wembT[:, k:k + 1] * his_t[k:k + 1, :]

    @pl.when(t == 0)
    def _init():
        # state0 = [x[:,0] | v[:,0] | embedding(his[:,0])]
        state_ref[0:6, :] = xv_t
        state_ref[6:8, :] = jnp.zeros((2, xv_t.shape[1]), xv_t.dtype)
        state_ref[8:, :] = h_emb

    @pl.when(t > 0)
    def _attn_step():
        # TODO(synk): the real SEGNO_GCL integrator (T message-passing layers over
        # `edges`) would transform the carried state here; source not provided, so it
        # is an identity pass-through.
        st = state_ref[...]                  # carried state (model output, idx 1)
        x1 = st[0:3, :]
        v1 = st[3:6, :]
        h1 = st[8:, :]
        x0 = xv_t[0:3, :]                    # next input frame (idx 0)
        v0 = xv_t[3:6, :]
        h0 = h_emb

        # speeds ||v||  -> (1, tile) lane-dense
        s0 = jnp.sqrt(v0[0:1, :] * v0[0:1, :] + v0[1:2, :] * v0[1:2, :]
                      + v0[2:3, :] * v0[2:3, :])
        s1 = jnp.sqrt(v1[0:1, :] * v1[0:1, :] + v1[1:2, :] * v1[1:2, :]
                      + v1[2:3, :] * v1[2:3, :])

        # attention MLP hidden: (H,H) @ (H,tile)  -> node tile on the MXU N dim.
        w1hT = w1hT_ref[...]
        hid0 = jnp.tanh(w1s * s0 + b1
                        + jnp.dot(w1hT, h0, preferred_element_type=jnp.float32))
        hid1 = jnp.tanh(w1s * s1 + b1
                        + jnp.dot(w1hT, h1, preferred_element_type=jnp.float32))

        # final Linear (H -> 1) as VPU multiply + sublane reduce; its bias b2 cancels
        # exactly in the two-way softmax, so it is dropped.
        l0 = jnp.sum(hid0 * w2, axis=0, keepdims=True)       # (1, tile)
        l1 = jnp.sum(hid1 * w2, axis=0, keepdims=True)

        # pair softmax over the time dimension (dim=1 in the torch code)
        m = jnp.maximum(l0, l1)
        e0 = jnp.exp(l0 - m)
        e1 = jnp.exp(l1 - m)
        inv = pl.reciprocal(e0 + e1, approx=True)
        a0 = e0 * inv
        a1 = e1 * inv

        state_ref[0:3, :] = a0 * x0 + a1 * x1
        state_ref[3:6, :] = a0 * v0 + a1 * v1
        state_ref[8:, :] = a0 * h0 + a1 * h1


def _segno_fused_call(wembT, w1hT, pvec, xv_fm, his_fm, *, tile):
    n_frames, _, bn_pad = xv_fm.shape
    H = w1hT.shape[0]
    fin = his_fm.shape[1]
    W = 8 + H
    nb = bn_pad // tile

    flops = int(bn_pad * n_frames * 2 * fin * H
                + bn_pad * max(n_frames - 1, 0) * (4 * H * H + 48 * H))
    trans = int(bn_pad * max(n_frames - 1, 0) * (2 * H + 5))
    bytes_acc = int(4 * (n_frames * bn_pad * (6 + fin) + bn_pad * W
                         + fin * H + H * H + 4 * H))

    return pl.pallas_call(
        _segno_fused_kernel,
        grid=(nb, n_frames),
        in_specs=[
            pl.BlockSpec((None, 6, tile), lambda b, t: (t, 0, b)),     # xv frames
            pl.BlockSpec((None, fin, tile), lambda b, t: (t, 0, b)),   # his frames
            pl.BlockSpec((H, fin), lambda b, t: (0, 0)),               # W_emb^T
            pl.BlockSpec((H, H), lambda b, t: (0, 0)),                 # W1_his^T
            pl.BlockSpec((H, 4), lambda b, t: (0, 0)),                 # [b_emb|w1s|b1|w2]
        ],
        out_specs=pl.BlockSpec((W, tile), lambda b, t: (0, b)),        # resident state
        out_shape=jax.ShapeDtypeStruct((W, bn_pad), jnp.float32),
        compiler_params=pltpu.CompilerParams(
            dimension_semantics=("parallel", "arbitrary")),
        cost_estimate=pl.CostEstimate(
            flops=flops, transcendentals=trans, bytes_accessed=bytes_acc),
    )(xv_fm, his_fm, wembT, w1hT, pvec)


# ----------------------------------------------------------------------------
# Forward wrapper (matches the second, overriding SEGNO.forward, attn aggregation)
# ----------------------------------------------------------------------------
def segno_forward(params, his, x, edges, v, edge_attr, T=10, in_steps=None):
    # TODO(synk): edges / edge_attr / T are only consumed by the (missing) SEGNO_GCL
    # integrator, which is an identity pass-through here.
    del edges, edge_attr, T

    if x.ndim != 3:
        x = x[:, None, :]
        v = v[:, None, :]
        his = his[:, None, :]
        n_frames = 1
    else:
        if in_steps is None:
            raise ValueError("in_steps must be provided for multi-frame input")
        # steps = diff(in_steps) + [T]; with the identity forward_step only the
        # number of frames (= len(in_steps)) matters.
        n_frames = len(in_steps)

    BN = x.shape[0]
    H = params["W_emb"].shape[1]

    tile, bn_pad = _pick_tile(BN)
    pad = bn_pad - BN

    # Feature-major, lane-dense packing: frames on dim 0, features on sublanes,
    # nodes on the 128-lane axis (layout plumbing done by XLA in the wrapper).
    xv = jnp.concatenate([x[:, :n_frames, :], v[:, :n_frames, :]], axis=-1)  # (BN,F,6)
    xv_fm = jnp.transpose(xv, (1, 2, 0)).astype(jnp.float32)                 # (F,6,BN)
    his_fm = jnp.transpose(his[:, :n_frames, :], (1, 2, 0)).astype(jnp.float32)
    if pad:
        xv_fm = jnp.pad(xv_fm, ((0, 0), (0, 0), (0, pad)))
        his_fm = jnp.pad(his_fm, ((0, 0), (0, 0), (0, pad)))

    # Parameter packing for the feature-major kernel.
    wembT = params["W_emb"].T.astype(jnp.float32)                  # (H, Fin)
    w1hT = params["W1"][1:, :].T.astype(jnp.float32)               # (H, H)
    pvec = jnp.stack(
        [params["b_emb"], params["W1"][0, :], params["b1"], params["W2"]],
        axis=1).astype(jnp.float32)                                # (H, 4)
    # params["b2"] is intentionally dropped: it cancels exactly in the pair softmax.

    state = _segno_fused_call(wembT, w1hT, pvec, xv_fm, his_fm, tile=tile)

    x_ = state[0:3, :BN].T
    v_ = state[3:6, :BN].T
    h_ = state[8:8 + H, :BN].T
    return x_, h_, v_


# ----------------------------------------------------------------------------
# Pure-JAX reference (SEGNO_GCL identity), used only for the correctness check
# ----------------------------------------------------------------------------
def segno_reference(params, his, x, v, in_steps=None):
    if x.ndim != 3:
        x = x[:, None, :]
        v = v[:, None, :]
        his = his[:, None, :]
        n_frames = 1
    else:
        n_frames = len(in_steps)
    h_all = his @ params["W_emb"] + params["b_emb"]
    x_, v_, h_ = x[:, 0], v[:, 0], h_all[:, 0]
    W1, b1, W2, b2 = params["W1"], params["b1"], params["W2"], params["b2"]
    for i in range(n_frames - 1):
        # forward_step: identity (SEGNO_GCL not provided)
        xs = jnp.stack([x[:, i + 1], x_], axis=1)
        vs = jnp.stack([v[:, i + 1], v_], axis=1)
        hs = jnp.stack([h_all[:, i + 1], h_], axis=1)
        speed = jnp.linalg.norm(vs, axis=-1, keepdims=True)
        feats = jnp.concatenate([speed, hs], axis=-1)
        logit = jnp.tanh(feats @ W1 + b1) @ W2[:, None] + b2
        attn = jax.nn.softmax(logit, axis=1)
        x_ = jnp.sum(attn * xs, axis=1)
        v_ = jnp.sum(attn * vs, axis=1)
        h_ = jnp.sum(attn * hs, axis=1)
    return x_, h_, v_


# ----------------------------------------------------------------------------
# Deterministic parameter init (PyTorch nn.Linear-style uniform bounds)
# ----------------------------------------------------------------------------
def init_params(key, in_node_nf, hidden_nf):
    ks = jax.random.split(key, 6)

    def lin(kw, kb, fan_in, fan_out):
        bound = 1.0 / float(fan_in) ** 0.5
        W = jax.random.uniform(kw, (fan_in, fan_out), jnp.float32, -bound, bound)
        b = jax.random.uniform(kb, (fan_out,), jnp.float32, -bound, bound)
        return W, b

    W_emb, b_emb = lin(ks[0], ks[1], in_node_nf, hidden_nf)      # embedding
    W1, b1 = lin(ks[2], ks[3], hidden_nf + 1, hidden_nf)         # attn_mlp[0]
    W2, b2 = lin(ks[4], ks[5], hidden_nf, 1)                     # attn_mlp[2]
    return dict(W_emb=W_emb, b_emb=b_emb, W1=W1, b1=b1,
                W2=W2[:, 0], b2=b2[0])


# ----------------------------------------------------------------------------
# Demo
# ----------------------------------------------------------------------------
if __name__ == "__main__":
    key = jax.random.PRNGKey(0)
    BN, Tin, Fin, H = 600, 3, 4, 32      # nodes, input frames, in_node_nf, hidden_nf
    E, De = 64, 2                        # edges, in_edge_nf
    in_steps = (0, 4, 8)

    k = jax.random.split(key, 6)
    his = jax.random.normal(k[0], (BN, Tin, Fin), jnp.float32)
    x = jax.random.normal(k[1], (BN, Tin, 3), jnp.float32)
    v = jax.random.normal(k[2], (BN, Tin, 3), jnp.float32)
    edge_attr = jax.random.normal(k[3], (E, De), jnp.float32)
    edges = jax.random.randint(k[4], (2, E), 0, BN, jnp.int32)
    params = init_params(k[5], Fin, H)

    x_out, h_out, v_out = segno_forward(
        params, his, x, edges, v, edge_attr, T=10, in_steps=in_steps)
    jax.block_until_ready((x_out, h_out, v_out))

    assert x_out.shape == (BN, 3) and v_out.shape == (BN, 3) and h_out.shape == (BN, H)
    assert bool(jnp.all(jnp.isfinite(x_out))) and bool(jnp.all(jnp.isfinite(h_out)))

    # correctness check against a pure-JAX reference (loose tolerance covers the
    # EUP approximate-reciprocal softmax denominator)
    x_ref, h_ref, v_ref = segno_reference(params, his, x, v, in_steps=in_steps)
    np.testing.assert_allclose(np.asarray(x_out), np.asarray(x_ref), rtol=1e-2, atol=1e-2)
    np.testing.assert_allclose(np.asarray(v_out), np.asarray(v_ref), rtol=1e-2, atol=1e-2)
    np.testing.assert_allclose(np.asarray(h_out), np.asarray(h_ref), rtol=1e-2, atol=1e-2)

    print("KERNEL_OK")
</pallas_src>

<mosaic_0001>
module attributes {stable_mosaic.version = 11 : i64} {
  func.func @_segno_fused_kernel(%arg0: i32, %arg1: i32, %arg2: memref<1x6x128xf32, #tpu.memory_space<vmem>>, %arg3: memref<1x4x128xf32, #tpu.memory_space<vmem>>, %arg4: memref<32x4xf32, #tpu.memory_space<vmem>>, %arg5: memref<32x32xf32, #tpu.memory_space<vmem>>, %arg6: memref<32x4xf32, #tpu.memory_space<vmem>>, %arg7: memref<40x128xf32, #tpu.memory_space<vmem>>) attributes {dimension_semantics = [#tpu.dimension_semantics<parallel>, #tpu.dimension_semantics<arbitrary>], iteration_bounds = array<i64: 5, 3>, scalar_prefetch = 0 : i64, scratch_operands = 0 : i64, tpu.core_type = #tpu.core_type<tc>, window_params = [{transform_indices = @transform_0, window_bounds = array<i64: 1, 6, 128>}, {transform_indices = @transform_1, window_bounds = array<i64: 1, 4, 128>}, {pipeline_mode = #tpu.pipeline_mode<synchronous>, transform_indices = @transform_2, window_bounds = array<i64: 32, 4>}, {pipeline_mode = #tpu.pipeline_mode<synchronous>, transform_indices = @transform_3, window_bounds = array<i64: 32, 32>}, {pipeline_mode = #tpu.pipeline_mode<synchronous>, transform_indices = @transform_4, window_bounds = array<i64: 32, 4>}, {transform_indices = @transform_5, window_bounds = array<i64: 40, 128>}]} {
    %c0 = arith.constant 0 : index
    %c0_0 = arith.constant 0 : index
    %0 = vector.load %arg6[%c0, %c0_0] : memref<32x4xf32, #tpu.memory_space<vmem>>, vector<32x1xf32>
    %c0_1 = arith.constant 0 : index
    %c1 = arith.constant 1 : index
    %1 = vector.load %arg6[%c0_1, %c1] : memref<32x4xf32, #tpu.memory_space<vmem>>, vector<32x1xf32>
    %c0_2 = arith.constant 0 : index
    %c2 = arith.constant 2 : index
    %2 = vector.load %arg6[%c0_2, %c2] : memref<32x4xf32, #tpu.memory_space<vmem>>, vector<32x1xf32>
    %c0_3 = arith.constant 0 : index
    %c3 = arith.constant 3 : index
    %3 = vector.load %arg6[%c0_3, %c3] : memref<32x4xf32, #tpu.memory_space<vmem>>, vector<32x1xf32>
    %c0_4 = arith.constant 0 : index
    %c0_5 = arith.constant 0 : index
    %c0_6 = arith.constant 0 : index
    %4 = vector.load %arg2[%c0_4, %c0_5, %c0_6] : memref<1x6x128xf32, #tpu.memory_space<vmem>>, vector<1x6x128xf32>
    %5 = vector.shape_cast %4 : vector<1x6x128xf32> to vector<6x128xf32>
    %c0_7 = arith.constant 0 : index
    %c0_8 = arith.constant 0 : index
    %c0_9 = arith.constant 0 : index
    %6 = vector.load %arg3[%c0_7, %c0_8, %c0_9] : memref<1x4x128xf32, #tpu.memory_space<vmem>>, vector<1x4x128xf32>
    %7 = vector.shape_cast %6 : vector<1x4x128xf32> to vector<4x128xf32>
    %c0_10 = arith.constant 0 : index
    %c0_11 = arith.constant 0 : index
    %8 = vector.load %arg4[%c0_10, %c0_11] : memref<32x4xf32, #tpu.memory_space<vmem>>, vector<32x4xf32>
    %9 = vector.extract_strided_slice %8 {offsets = [0, 0], sizes = [32, 1], strides = [1, 1]} : vector<32x4xf32> to vector<32x1xf32>
    %10 = vector.extract_strided_slice %7 {offsets = [0, 0], sizes = [1, 128], strides = [1, 1]} : vector<4x128xf32> to vector<1x128xf32>
    %11 = vector.broadcast %9 : vector<32x1xf32> to vector<32x128xf32>
    %12 = vector.broadcast %10 : vector<1x128xf32> to vector<32x128xf32>
    %13 = arith.mulf %11, %12 : vector<32x128xf32>
    %14 = vector.broadcast %0 : vector<32x1xf32> to vector<32x128xf32>
    %15 = arith.addf %14, %13 : vector<32x128xf32>
    %16 = vector.extract_strided_slice %8 {offsets = [0, 1], sizes = [32, 1], strides = [1, 1]} : vector<32x4xf32> to vector<32x1xf32>
    %17 = vector.extract_strided_slice %7 {offsets = [1, 0], sizes = [1, 128], strides = [1, 1]} : vector<4x128xf32> to vector<1x128xf32>
    %18 = vector.broadcast %16 : vector<32x1xf32> to vector<32x128xf32>
    %19 = vector.broadcast %17 : vector<1x128xf32> to vector<32x128xf32>
    %20 = arith.mulf %18, %19 : vector<32x128xf32>
    %21 = arith.addf %15, %20 : vector<32x128xf32>
    %22 = vector.extract_strided_slice %8 {offsets = [0, 2], sizes = [32, 1], strides = [1, 1]} : vector<32x4xf32> to vector<32x1xf32>
    %23 = vector.extract_strided_slice %7 {offsets = [2, 0], sizes = [1, 128], strides = [1, 1]} : vector<4x128xf32> to vector<1x128xf32>
    %24 = vector.broadcast %22 : vector<32x1xf32> to vector<32x128xf32>
    %25 = vector.broadcast %23 : vector<1x128xf32> to vector<32x128xf32>
    %26 = arith.mulf %24, %25 : vector<32x128xf32>
    %27 = arith.addf %21, %26 : vector<32x128xf32>
    %28 = vector.extract_strided_slice %8 {offsets = [0, 3], sizes = [32, 1], strides = [1, 1]} : vector<32x4xf32> to vector<32x1xf32>
    %29 = vector.extract_strided_slice %7 {offsets = [3, 0], sizes = [1, 128], strides = [1, 1]} : vector<4x128xf32> to vector<1x128xf32>
    %30 = vector.broadcast %28 : vector<32x1xf32> to vector<32x128xf32>
    %31 = vector.broadcast %29 : vector<1x128xf32> to vector<32x128xf32>
    %32 = arith.mulf %30, %31 : vector<32x128xf32>
    %33 = arith.addf %27, %32 : vector<32x128xf32>
    %c0_i32 = arith.constant 0 : i32
    %34 = arith.cmpi eq, %arg1, %c0_i32 : i32
    %35 = arith.extui %34 : i1 to i32
    %c0_i32_12 = arith.constant 0 : i32
    %36 = arith.cmpi ne, %35, %c0_i32_12 : i32
    scf.if %36 {
      %c0_15 = arith.constant 0 : index
      %c0_16 = arith.constant 0 : index
      %40 = vector.load %arg7[%c0_15, %c0_16] : memref<40x128xf32, #tpu.memory_space<vmem>>, vector<6x128xf32>
      tpu.vector_store %arg7[%c0_15, %c0_16], %5 {strides = array<i32>} : memref<40x128xf32, #tpu.memory_space<vmem>>, vector<6x128xf32>,
      %cst = arith.constant 0.000000e+00 : f32
      %41 = vector.broadcast %cst : f32 to vector<2x128xf32>
      %c6 = arith.constant 6 : index
      %c0_17 = arith.constant 0 : index
      %42 = vector.load %arg7[%c6, %c0_17] : memref<40x128xf32, #tpu.memory_space<vmem>>, vector<2x128xf32>
      tpu.vector_store %arg7[%c6, %c0_17], %41 {strides = array<i32>} : memref<40x128xf32, #tpu.memory_space<vmem>>, vector<2x128xf32>,
      %c8 = arith.constant 8 : index
      %c0_18 = arith.constant 0 : index
      %43 = vector.load %arg7[%c8, %c0_18] : memref<40x128xf32, #tpu.memory_space<vmem>>, vector<32x128xf32>
      tpu.vector_store %arg7[%c8, %c0_18], %33 {strides = array<i32>} : memref<40x128xf32, #tpu.memory_space<vmem>>, vector<32x128xf32>,
    } else {
    }
    %c0_i32_13 = arith.constant 0 : i32
    %37 = arith.cmpi sgt, %arg1, %c0_i32_13 : i32
    %38 = arith.extui %37 : i1 to i32
    %c0_i32_14 = arith.constant 0 : i32
    %39 = arith.cmpi ne, %38, %c0_i32_14 : i32
    scf.if %39 {
      %c0_15 = arith.constant 0 : index
      %c0_16 = arith.constant 0 : index
      %40 = vector.load %arg7[%c0_15, %c0_16] : memref<40x128xf32, #tpu.memory_space<vmem>>, vector<40x128xf32>
      %41 = vector.extract_strided_slice %40 {offsets = [0, 0], sizes = [3, 128], strides = [1, 1]} : vector<40x128xf32> to vector<3x128xf32>
      %42 = vector.extract_strided_slice %40 {offsets = [3, 0], sizes = [3, 128], strides = [1, 1]} : vector<40x128xf32> to vector<3x128xf32>
      %43 = vector.extract_strided_slice %40 {offsets = [8, 0], sizes = [32, 128], strides = [1, 1]} : vector<40x128xf32> to vector<32x128xf32>
      %44 = vector.extract_strided_slice %5 {offsets = [0, 0], sizes = [3, 128], strides = [1, 1]} : vector<6x128xf32> to vector<3x128xf32>
      %45 = vector.extract_strided_slice %5 {offsets = [3, 0], sizes = [3, 128], strides = [1, 1]} : vector<6x128xf32> to vector<3x128xf32>
      %46 = vector.extract_strided_slice %45 {offsets = [0, 0], sizes = [1, 128], strides = [1, 1]} : vector<3x128xf32> to vector<1x128xf32>
      %47 = vector.extract_strided_slice %45 {offsets = [0, 0], sizes = [1, 128], strides = [1, 1]} : vector<3x128xf32> to vector<1x128xf32>
      %48 = arith.mulf %46, %47 : vector<1x128xf32>
      %49 = vector.extract_strided_slice %45 {offsets = [1, 0], sizes = [1, 128], strides = [1, 1]} : vector<3x128xf32> to vector<1x128xf32>
      %50 = vector.extract_strided_slice %45 {offsets = [1, 0], sizes = [1, 128], strides = [1, 1]} : vector<3x128xf32> to vector<1x128xf32>
      %51 = arith.mulf %49, %50 : vector<1x128xf32>
      %52 = arith.addf %48, %51 : vector<1x128xf32>
      %53 = vector.extract_strided_slice %45 {offsets = [2, 0], sizes = [1, 128], strides = [1, 1]} : vector<3x128xf32> to vector<1x128xf32>
      %54 = vector.extract_strided_slice %45 {offsets = [2, 0], sizes = [1, 128], strides = [1, 1]} : vector<3x128xf32> to vector<1x128xf32>
      %55 = arith.mulf %53, %54 : vector<1x128xf32>
      %56 = arith.addf %52, %55 : vector<1x128xf32>
      %57 = math.sqrt %56 : vector<1x128xf32>
      %58 = vector.extract_strided_slice %42 {offsets = [0, 0], sizes = [1, 128], strides = [1, 1]} : vector<3x128xf32> to vector<1x128xf32>
      %59 = vector.extract_strided_slice %42 {offsets = [0, 0], sizes = [1, 128], strides = [1, 1]} : vector<3x128xf32> to vector<1x128xf32>
      %60 = arith.mulf %58, %59 : vector<1x128xf32>
      %61 = vector.extract_strided_slice %42 {offsets = [1, 0], sizes = [1, 128], strides = [1, 1]} : vector<3x128xf32> to vector<1x128xf32>
      %62 = vector.extract_strided_slice %42 {offsets = [1, 0], sizes = [1, 128], strides = [1, 1]} : vector<3x128xf32> to vector<1x128xf32>
      %63 = arith.mulf %61, %62 : vector<1x128xf32>
      %64 = arith.addf %60, %63 : vector<1x128xf32>
      %65 = vector.extract_strided_slice %42 {offsets = [2, 0], sizes = [1, 128], strides = [1, 1]} : vector<3x128xf32> to vector<1x128xf32>
      %66 = vector.extract_strided_slice %42 {offsets = [2, 0], sizes = [1, 128], strides = [1, 1]} : vector<3x128xf32> to vector<1x128xf32>
      %67 = arith.mulf %65, %66 : vector<1x128xf32>
      %68 = arith.addf %64, %67 : vector<1x128xf32>
      %69 = math.sqrt %68 : vector<1x128xf32>
      %c0_17 = arith.constant 0 : index
      %c0_18 = arith.constant 0 : index
      %70 = vector.load %arg5[%c0_17, %c0_18] : memref<32x32xf32, #tpu.memory_space<vmem>>, vector<32x32xf32>
      %71 = vector.broadcast %1 : vector<32x1xf32> to vector<32x128xf32>
      %72 = vector.broadcast %57 : vector<1x128xf32> to vector<32x128xf32>
      %73 = arith.mulf %71, %72 : vector<32x128xf32>
      %74 = vector.broadcast %2 : vector<32x1xf32> to vector<32x128xf32>
      %75 = arith.addf %73, %74 : vector<32x128xf32>
      %cst = arith.constant dense<0.000000e+00> : vector<32x128xf32>
      %76 = tpu.matmul %70, %33, %cst {dimension_numbers = #tpu.dot_dimension_numbers<[1], [0], [0], [1], [0, 0, 1, 1], [], []>} : vector<32x32xf32>, vector<32x128xf32>, vector<32x128xf32> -> vector<32x128xf32>
      %77 = arith.addf %75, %76 : vector<32x128xf32>
      %78 = math.tanh %77 : vector<32x128xf32>
      %79 = vector.broadcast %1 : vector<32x1xf32> to vector<32x128xf32>
      %80 = vector.broadcast %69 : vector<1x128xf32> to vector<32x128xf32>
      %81 = arith.mulf %79, %80 : vector<32x128xf32>
      %82 = vector.broadcast %2 : vector<32x1xf32> to vector<32x128xf32>
      %83 = arith.addf %81, %82 : vector<32x128xf32>
      %cst_19 = arith.constant dense<0.000000e+00> : vector<32x128xf32>
      %84 = tpu.matmul %70, %43, %cst_19 {dimension_numbers = #tpu.dot_dimension_numbers<[1], [0], [0], [1], [0, 0, 1, 1], [], []>} : vector<32x32xf32>, vector<32x128xf32>, vector<32x128xf32> -> vector<32x128xf32>
      %85 = arith.addf %83, %84 : vector<32x128xf32>
      %86 = math.tanh %85 : vector<32x128xf32>
      %87 = vector.broadcast %3 : vector<32x1xf32> to vector<32x128xf32>
      %88 = arith.mulf %78, %87 : vector<32x128xf32>
      %cst_20 = arith.constant dense<0.000000e+00> : vector<128xf32>
      %89 = vector.multi_reduction <add>, %88, %cst_20 [0] : vector<32x128xf32> to vector<128xf32>
      %90 = vector.shape_cast %89 : vector<128xf32> to vector<1x128xf32>
      %91 = vector.broadcast %3 : vector<32x1xf32> to vector<32x128xf32>
      %92 = arith.mulf %86, %91 : vector<32x128xf32>
      %cst_21 = arith.constant dense<0.000000e+00> : vector<128xf32>
      %93 = vector.multi_reduction <add>, %92, %cst_21 [0] : vector<32x128xf32> to vector<128xf32>
      %94 = vector.shape_cast %93 : vector<128xf32> to vector<1x128xf32>
      %95 = arith.maximumf %90, %94 : vector<1x128xf32>
      %96 = arith.subf %90, %95 : vector<1x128xf32>
      %97 = math.exp %96 : vector<1x128xf32>
      %98 = arith.subf %94, %95 : vector<1x128xf32>
      %99 = math.exp %98 : vector<1x128xf32>
      %100 = arith.addf %97, %99 : vector<1x128xf32>
      %101 = tpu.reciprocal %100 {approx = true} : vector<1x128xf32> -> vector<1x128xf32>
      %102 = arith.mulf %97, %101 : vector<1x128xf32>
      %103 = arith.mulf %99, %101 : vector<1x128xf32>
      %104 = vector.broadcast %102 : vector<1x128xf32> to vector<3x128xf32>
      %105 = arith.mulf %104, %44 : vector<3x128xf32>
      %106 = vector.broadcast %103 : vector<1x128xf32> to vector<3x128xf32>
      %107 = arith.mulf %106, %41 : vector<3x128xf32>
      %108 = arith.addf %105, %107 : vector<3x128xf32>
      %c0_22 = arith.constant 0 : index
      %c0_23 = arith.constant 0 : index
      %109 = vector.load %arg7[%c0_22, %c0_23] : memref<40x128xf32, #tpu.memory_space<vmem>>, vector<3x128xf32>
      tpu.vector_store %arg7[%c0_22, %c0_23], %108 {strides = array<i32>} : memref<40x128xf32, #tpu.memory_space<vmem>>, vector<3x128xf32>,
      %110 = vector.broadcast %102 : vector<1x128xf32> to vector<3x128xf32>
      %111 = arith.mulf %110, %45 : vector<3x128xf32>
      %112 = vector.broadcast %103 : vector<1x128xf32> to vector<3x128xf32>
      %113 = arith.mulf %112, %42 : vector<3x128xf32>
      %114 = arith.addf %111, %113 : vector<3x128xf32>
      %c3_24 = arith.constant 3 : index
      %c0_25 = arith.constant 0 : index
      %115 = vector.load %arg7[%c3_24, %c0_25] : memref<40x128xf32, #tpu.memory_space<vmem>>, vector<3x128xf32>
      tpu.vector_store %arg7[%c3_24, %c0_25], %114 {strides = array<i32>} : memref<40x128xf32, #tpu.memory_space<vmem>>, vector<3x128xf32>,
      %116 = vector.broadcast %102 : vector<1x128xf32> to vector<32x128xf32>
      %117 = arith.mulf %116, %33 : vector<32x128xf32>
      %118 = vector.broadcast %103 : vector<1x128xf32> to vector<32x128xf32>
      %119 = arith.mulf %118, %43 : vector<32x128xf32>
      %120 = arith.addf %117, %119 : vector<32x128xf32>
      %c8 = arith.constant 8 : index
      %c0_26 = arith.constant 0 : index
      %121 = vector.load %arg7[%c8, %c0_26] : memref<40x128xf32, #tpu.memory_space<vmem>>, vector<32x128xf32>
      tpu.vector_store %arg7[%c8, %c0_26], %120 {strides = array<i32>} : memref<40x128xf32, #tpu.memory_space<vmem>>, vector<32x128xf32>,
    } else {
    }
    return
  }
  func.func @transform_0(%arg0: i32, %arg1: i32) -> (i32, i32, i32) {
    %c0_i32 = arith.constant 0 : i32
    %c0_i32_0 = arith.constant 0 : i32
    return %arg1, %c0_i32, %arg0 : i32, i32, i32
  }
  func.func @transform_1(%arg0: i32, %arg1: i32) -> (i32, i32, i32) {
    %c0_i32 = arith.constant 0 : i32
    %c0_i32_0 = arith.constant 0 : i32
    return %arg1, %c0_i32, %arg0 : i32, i32, i32
  }
  func.func @transform_2(%arg0: i32, %arg1: i32) -> (i32, i32) {
    %c0_i32 = arith.constant 0 : i32
    %c0_i32_0 = arith.constant 0 : i32
    %c0_i32_1 = arith.constant 0 : i32
    return %c0_i32, %c0_i32_0 : i32, i32
  }
  func.func @transform_3(%arg0: i32, %arg1: i32) -> (i32, i32) {
    %c0_i32 = arith.constant 0 : i32
    %c0_i32_0 = arith.constant 0 : i32
    %c0_i32_1 = arith.constant 0 : i32
    return %c0_i32, %c0_i32_0 : i32, i32
  }
  func.func @transform_4(%arg0: i32, %arg1: i32) -> (i32, i32) {
    %c0_i32 = arith.constant 0 : i32
    %c0_i32_0 = arith.constant 0 : i32
    %c0_i32_1 = arith.constant 0 : i32
    return %c0_i32, %c0_i32_0 : i32, i32
  }
  func.func @transform_5(%arg0: i32, %arg1: i32) -> (i32, i32) {
    %c0_i32 = arith.constant 0 : i32
    %c0_i32_0 = arith.constant 0 : i32
    return %c0_i32, %arg0 : i32, i32
  }
}

</mosaic_0001>

<bundles_post_ra>
// kernel: tpu_custom_call.1
= control target key start
LH: loop header
LB: loop body
LE: loop exit
PB: predicated region body
PF: predicated region fallthrough
CT: control target
= control target key end

     0   :  { %s1629_s0 = inlined_call_operand.hbm [shape: f32[3,6,640], index: 0, kind: input, shape index: {}]   ;;  %s1630_s1 = inlined_call_operand.vmem [shape: f32[3,4,640], index: 1, kind: input, shape index: {}]   ;;  %s1631_s2 = inlined_call_operand.vmem [shape: f32[32,4], index: 2, kind: input, shape index: {}]   ;;  %s1632_s3 = inlined_call_operand.hbm [shape: f32[32,32], index: 3, kind: input, shape index: {}]   ;;  %s1633_s4 = inlined_call_operand.vmem [shape: f32[32,4], index: 4, kind: input, shape index: {}]   ;;  %s1634_s5 = inlined_call_operand.hbm [shape: f32[40,640], index: 5, kind: output, shape index: {}]  }
   0x1   :  { %1642 = sst [smem:[#allocation17_spill]] %s1632_s3 }
   0x2   :  { %1643 = sst [smem:[#allocation18_spill]] %s1634_s5 }
   0x3   :  { %10 = vsyncpa [#allocation3], 0 }
   0x4   :  { %12 = vsyncpa [#allocation3 + $0x1], 0 }
   0x5   :  { %13 = vsyncpa [#allocation6], 0 }
   0x6   :  { %14 = vsyncpa [#allocation4], 0 }
   0x7   :  { %16 = vsyncpa [#allocation4 + $0x1], 0  ;;  %s1283_s18 = smov 0   ;;  %s1285_s19 = smov 0  }
   0x8   :  { %s1287_s20 = smov 0   ;;  %s1289_s21 = smov 0  }
   0x9   :  { %s1291_s22 = smov 0   ;;  %s1293_s23 = smov 0  }
   0xa   :  { %s1295_s24 = smov 0   ;;  %s1297_s25 = smov 0  }
   0xb   :  { %s1299_s26 = smov 0   ;;  %s1301_s27 = smov 0  }
   0xc   :  { %s1303_s28 = smov 0  }
   0xd LB: > { %1644 = sst [smem:[#allocation11_spill]] %s1197_s18  ;;  %s843_s29 = sadd.s32 4294967295, %s1237_s28   ;;  %s1237_s28 = sphi %s1303_s28, %s22_s28   ;;  %s1233_s27 = sphi %s1301_s27, %s1673_s27   ;;  %s1229_s26 = sphi %s1299_s26, %s1672_s26   ;;  %s1225_s25 = sphi %s1297_s25, %s1671_s25   ;;  %s1221_s24 = sphi %s1295_s24, %s1670_s24   ;;  %s1217_s23 = sphi %s1293_s23, %s1669_s23   ;;  %s1213_s22 = sphi %s1291_s22, %s1668_s22   ;;  %s1209_s21 = sphi %s1289_s21, %s1667_s21   ;;  %s1205_s20 = sphi %s1287_s20, %s1662_s20   ;;  %s1201_s19 = sphi %s1285_s19, %s1666_s19   ;;  %s1197_s18 = sphi %s1283_s18, %s1665_s18  }
   0xe   : > { %1645 = sst [smem:[#allocation12_spill]] %s1205_s20  ;;  %p845_p0 = scmp.ge.s32.totalorder %s1237_s28, 1 }
   0xf   : > { %p1340_p1 = scmp.eq.s32.totalorder %s843_s29, 0  ;;  %p1344_p2 = scmp.eq.s32.totalorder %s843_s29, 14 }
  0x10   : > { %p184_p3 = scmp.lt.s32.totalorder %s1237_s28, 16  ;;  %s1648_s3 = sld [smem:[#allocation17_spill]] }
  0x11   : > { %s1239_s11 = smov [#allocation5]   ;;  %s1240_s13 = smov 128  }
  0x12   : > { %p1352_p4 = pnand %p845_p0, %p184_p3  ;;  %s200_s12 = sshll.u32 %s1239_s11, 4  ;;  %s201_s12 = int_to_ptr.vmem [resolvable:$true] %s200_s12 }
  0x13   : > { %s1241_s14 = smov 8   ;;  %s844_s15 = sadd.s32 4294967294, %s1237_s28  }
  0x14   : > { %p886_p5 = pneg %p1352_p4  ;;  %s31_s16 = sadd.s32 1, %s1229_s26 }
  0x15   : > { %p32_p7 = scmp.ge.s32.totalorder %s31_s16, 3  ;;  %s34_s17 = sadd.s32 1, %s1233_s27 }
  0x16   : > { %s198_s9 = sshll.u32 %s1648_s3, 4  ;;  %p887_p6 = pnand %p886_p5, %p1340_p1  ;;  %s199_s9 = int_to_ptr.hbm [resolvable:$true] %s198_s9 }
  0x17   : > { %s43_s29 = sadd.s32 1, %s1217_s23  ;;  %p50_p8 = scmp.ne.s32.totalorder %s1217_s23, %s1213_s22 }
  0x18   : > { %889 = dma.hbm_to_vmem [thread:$0]  (!%p887_p6), %s199_s9, 512, %s201_s12, [#allocation6], %s1240_s13, %s1240_s13, %s1241_s14  }
  0x19   : > { %s1675_s16 = smov (%p32_p7, %s31_s16), 0  ;;  %s1677_s17 = smov (!%p32_p7, %s34_s17), %s1233_s27 }
  0x1a   : > { %1650 = sst [smem:[#allocation13_spill]] %s1675_s16  ;;  %s38_s7 = ssub.s32 %s1229_s26, %s1675_s16 }
  0x1b   : > { %p51_p9 = scmp.eq.s32.totalorder %s1237_s28, 0  ;;  %p36_p10 = scmp.ge.s32.totalorder %s1677_s17, 5 }
  0x1c   : > { %p56_p11 = scmp.ne.s32.totalorder %s1213_s22, %s1209_s21  ;;  %s160_s9 = sadd.s32 1, %s1205_s20 }
  0x1d   : > { %p1374_p12 = por %p51_p9, %p50_p8  ;;  %s1679_s17 = smov (%p36_p10, %s1677_s17), 0 }
  0x1e   : > { %1652 = sst [smem:[#allocation14_spill]] %s1679_s17  ;;  %p1383_p13 = por %p1340_p1, %p56_p11 }
  0x1f   : > { %p170_p0 = scmp.ne.s32.totalorder %s1205_s20, %s1201_s19  ;;  %s39_s12 = ssub.s32 %s1233_s27, %s1679_s17 }
  0x20   : > { %p176_p3 = scmp.ne.s32.totalorder %s1201_s19, %s1197_s18  ;;  %s40_s21 = sor.u32 %s39_s12, %s38_s7 }
  0x21   : > { %p158_p5 = scmp.eq.s32.totalorder %s39_s12, 0  ;;  %p41_p6 = scmp.eq.s32.totalorder %s40_s21, 0 }
  0x22   : > { %p1395_p7 = por %p1344_p2, %p170_p0  ;;  %p177_p8 = scmp.eq.s32.totalorder %s844_s15, 14 }
  0x23   : > { %s1400_s14 = scalar_select %p158_p5, %s1205_s20, %s160_s9  }
  0x24   : > { %s1654_s13 = scalar_select %p1395_p7, 1, 0 }
  0x25   : > { %1656 = sst [smem:[#allocation16_spill]] %s1400_s14  ;;  %p899_p9 = scmp.lt.s32.totalorder %s1237_s28, 15 }
  0x26   : > { %1655 = sst [smem:[#allocation15_spill]] %s1654_s13  ;;  %s217_s16 = sand.u32 1, %s1217_s23  }
  0x27   : > { %s1403_s3 = scalar_select %p41_p6, %s1217_s23, %s43_s29  }
  0x28   : > { %s875_s5 = smul.u32 5, %s1229_s26  ;;  %p1408_p10 = por %p177_p8, %p176_p3 }
  0x29   : > { %s848_s7 = sshll.u32 %s217_s16, 3  ;;  %p891_p2 = pnand %p899_p9, %p1374_p12 }
  0x2a   : > { %s225_s6 = sadd.s32 %s1233_s27, %s875_s5  ;;  %s221_s14 = scalar_lea.vmem [#allocation2], %s848_s7 }
  0x2b   : > { %s849_s12 = sshll.u32 %s225_s6, 3  ;;  %s231_s20 = sshll.u32 %s221_s14, 4  ;;  %s232_s20 = int_to_ptr.vmem [resolvable:$true] %s231_s20 }
  0x2c   : > { %s227_s9 = scalar_lea.hbm %s1629_s0, %s849_s12  ;;  %s218_s15 = scalar_lea.sflag [#allocation3], %s217_s16 }
  0x2d   : > { %s229_s13 = sshll.u32 %s227_s9, 4  ;;  %251 = sbr.rel (%p1352_p4) target bundleno = 469 (0x1d5), region = 40  ;;  %s230_s13 = int_to_ptr.hbm [resolvable:$true] %s229_s13 }
  0x2e   : > { %893 = dma.hbm_to_vmem [thread:$0]  (!%p891_p2), %s230_s13, 128, %s232_s20, %s218_s15  }
  0x2f   : > { %s253_s5 = sand.u32 (!%p1352_p4), 1, %s1213_s22  }
  0x30   : > { %s851_s29 = sshll.u32 (!%p1352_p4), %s253_s5, 3  ;;  %s254_s6 = scalar_lea.sflag (!%p1352_p4), [#allocation3], %s253_s5 }
  0x31   : > { %s257_s18 = scalar_lea.vmem (!%p1352_p4), [#allocation2], %s851_s29 }
  0x32   : > { %1184 = dma.done.wait (%p1383_p13), %s254_s6, 128  }
  0x33   : > { %1186 = vsyncadd (%p1383_p13), %s254_s6, 4294967168 }
  0x34   : > { %1188 = dma.done.wait (%p1340_p1), [#allocation6], 512  }
  0x35   : > { %1190 = vsyncadd (%p1340_p1), [#allocation6], 4294966784  ;;  %v1242_v0 = vmov 0   ;;  %v1431_v1 = vld [vmem:[%s257_s18] sm:$0x3f]  ;;  %v314_v2 = vld [vmem:[%s1631_s2 + $0x10] sm:$0xff] }
  0x36   : > { %1005 = vset.pattern.permute.xlu1 %v1242_v0  ;;  %1004 = vset.pattern.permute.xlu0 %v1242_v0  ;;  %v312_v3 = vld [vmem:[%s1631_s2] sm:$0xff]  ;;  %v315_v5 = vld [vmem:[%s1631_s2 + $0x18] sm:$0xff]  ;;  %v313_v6 = vld [vmem:[%s1631_s2 + $0x8] sm:$0xff]  ;;  %v1243_v10 = vmov 1   ;;  %v1244_v11 = vmov 2   ;;  %s295_s18 = sand.u32 1, %s1201_s19  }
  0x37   : > { %1006 = vset.pattern.permute.xlu2 %v1242_v0  ;;  %328 = vperm.xlu1 %1005, %v314_v2   ;;  %v1442_v4 = vld [vmem:[%s1633_s4] sm:$0xff]  ;;  %v1454_v7 = vld [vmem:[%s1633_s4 + $0x8] sm:$0xff]  ;;  %v1460_v8 = vld [vmem:[%s1633_s4 + $0x18] sm:$0xff]  ;;  %s1472_s20 = smul.u32 40, %s295_s18  ;;  %v1245_v12 = vmov 3   ;;  %p298_p1 = scmp.lt.s32.totalorder %s1221_s24, 2 }
  0x38   : > { %318 = vperm.xlu0 %1004, %v312_v3   ;;  %343 = vperm.xlu2 %1006, %v1442_v4   ;;  %v1465_v9 = vld [vmem:[%s1633_s4 + $0x10] sm:$0xff]  ;;  %p300_p4 = scmp.lt.s32.totalorder %s1225_s25, 4  ;;  %p854_p11 = scmp.ne.s32.totalorder %s1221_s24, 0 }
  0x39   : > { %s299_s10 = scalar_select %p298_p1, %s1221_s24, 2 }
  0x3a   : > { %s301_s16 = scalar_select %p300_p4, %s1225_s25, 4 }
  0x3b   : > { %s877_s8 = smul.u32 5, %s299_s10  ;;  %s1490_s12 = scalar_lea.vmem [#allocation7], %s1472_s20 }
  0x3d   : > { %s303_s11 = sadd.s32 %s877_s8, %s301_s16 }
  0x3e   : > { %s853_s13 = sshll.u32 %s303_s11, 2 }
  0x3f   : > { %333 = vperm.xlu1 %1005, %v315_v5   ;;  %s305_s7 = scalar_lea.vmem %s1630_s1, %s853_s13 }
  0x40   : > { %323 = vperm.xlu0 %1004, %v313_v6   ;;  %348 = vperm.xlu2 %1006, %v1454_v7   ;;  %v311_v24 = vld [vmem:[%s305_s7] sm:$0xf] }
  0x41   : > { %v336_v25 = vperm.slane %v311_v24, 0  ;;  %v381_v30 = vperm.slane %v311_v24, 1  ;;  %v431_v33 = vperm.slane %v311_v24, 3  ;;  %v406_v38 = vperm.slane %v311_v24, 2 }
  0x47   : > { %358 = vperm.xlu1 %1005, %v1460_v8  }
  0x48   : > { %353 = vperm.xlu0 %1004, %v1465_v9   ;;  %1007 = vset.pattern.permute.xlu2 %v1243_v10 }
  0x49   : > { %366 = vperm.xlu2 %1007, %v312_v3  }
  0x4f   : > { %1009 = vset.pattern.permute.xlu1 %v1243_v10 }
  0x50   : > { %1008 = vset.pattern.permute.xlu0 %v1243_v10  ;;  %374 = vperm.xlu1 %1009, %v314_v2  }
  0x51   : > { %370 = vperm.xlu0 %1008, %v313_v6   ;;  %378 = vperm.xlu2 %1007, %v315_v5  }
  0x58   : > { %1010 = vset.pattern.permute.xlu1 %v1244_v11 }
  0x59   : > { %1012 = vset.pattern.permute.xlu0 %v1244_v11  ;;  %391 = vperm.xlu1 %1010, %v312_v3  }
  0x5a   : > { %399 = vperm.xlu0 %1012, %v314_v2   ;;  %1011 = vset.pattern.permute.xlu2 %v1244_v11 }
  0x5b   : > { %395 = vperm.xlu2 %1011, %v313_v6  }
  0x61   : > { %403 = vperm.xlu1 %1010, %v315_v5  }
  0x62   : > { %1015 = vset.pattern.permute.xlu0 %v1245_v12 }
  0x63   : > { %428 = vperm.xlu0 %1015, %v315_v5   ;;  %1013 = vset.pattern.permute.xlu2 %v1245_v12 }
  0x64   : > { %416 = vperm.xlu2 %1013, %v312_v3  }
  0x69   : > { %1014 = vset.pattern.permute.xlu1 %v1245_v12 }
  0x6a   : > { %420 = vperm.xlu1 %1014, %v313_v6  }
  0x6c   : > { %424 = vperm.xlu2 %1013, %v314_v2  }
  0x92   : > { %v344_v13 = vpop.permute.xlu2 %343 }
  0x9a   : > { %v349_v14 = vpop.permute.xlu2 %348 }
  0xa3   : > { %v367_v15 = vpop.permute.xlu2 %366 }
  0xa4   : > { %v382_v32 = vmul.f32 %v381_v30, %v367_v15 }
  0xa9   : > { %v329_v16 = vpop.permute.xlu1 %328 }
  0xaa   : > { %v319_v17 = vpop.permute.xlu0 %318  ;;  %v339_v34 = vmul.f32 %v336_v25, %v329_v16 }
  0xab   : > { %v379_v18 = vpop.permute.xlu2 %378  ;;  %v337_v29 = vmul.f32 %v336_v25, %v319_v17 }
  0xac   : > { %v385_v50 = vmul.f32 %v381_v30, %v379_v18 }
  0xad   : > { %v361_v31 = vadd.f32 %v344_v13, %v337_v29 }
  0xaf   : > { %v386_v39 = vadd.f32 %v382_v32, %v361_v31 }
  0xb1   : > { %v334_v19 = vpop.permute.xlu1 %333 }
  0xb2   : > { %v324_v20 = vpop.permute.xlu0 %323  ;;  %v340_v47 = vmul.f32 %v336_v25, %v334_v19 }
  0xb3   : > { %v338_v54 = vmul.f32 %v336_v25, %v324_v20 }
  0xb5   : > { %v396_v21 = vpop.permute.xlu2 %395  ;;  %v362_v62 = vadd.f32 %v349_v14, %v338_v54 }
  0xb6   : > { %v408_v0 = vmul.f32 %v406_v38, %v396_v21 }
  0xb9   : > { %v359_v22 = vpop.permute.xlu1 %358 }
  0xba   : > { %v354_v23 = vpop.permute.xlu0 %353  ;;  %v364_v51 = vadd.f32 %v359_v22, %v340_v47 }
  0xbb   : > { %v363_v37 = vadd.f32 %v354_v23, %v339_v34 }
  0xbc   : > { %v389_v56 = vadd.f32 %v385_v50, %v364_v51 }
  0xbe   : > { %v417_v26 = vpop.permute.xlu2 %416 }
  0xbf   : > { %v432_v40 = vmul.f32 %v431_v33, %v417_v26 }
  0xc2   : > { %v375_v27 = vpop.permute.xlu1 %374 }
  0xc3   : > { %v371_v28 = vpop.permute.xlu0 %370  ;;  %v384_v35 = vmul.f32 %v381_v30, %v375_v27 }
  0xc4   : > { %v383_v59 = vmul.f32 %v381_v30, %v371_v28 }
  0xc5   : > { %v388_v43 = vadd.f32 %v384_v35, %v363_v37 }
  0xc6   : > { %v425_v36 = vpop.permute.xlu2 %424  ;;  %v387_v2 = vadd.f32 %v383_v59, %v362_v62 }
  0xc7   : > { %v434_v46 = vmul.f32 %v431_v33, %v425_v36 }
  0xc8   : > { %v412_v5 = vadd.f32 %v408_v0, %v387_v2 }
  0xcb   : > { %v392_v41 = vpop.permute.xlu1 %391 }
  0xcc   : > { %v400_v42 = vpop.permute.xlu0 %399  ;;  %v407_v44 = vmul.f32 %v406_v38, %v392_v41 }
  0xcd   : > { %v409_v45 = vmul.f32 %v406_v38, %v400_v42 }
  0xce   : > { %v411_v48 = vadd.f32 %v407_v44, %v386_v39 }
  0xcf   : > { %v413_v49 = vadd.f32 %v409_v45, %v388_v43 }
  0xd0   : > { %v1481_v52 = vadd.f32 %v432_v40, %v411_v48 }
  0xd1   : > { %v1483_v53 = vadd.f32 %v434_v46, %v413_v49 }
  0xd3   : > { %v404_v55 = vpop.permute.xlu1 %403 }
  0xd4   : > { %v410_v57 = vmul.f32 %v406_v38, %v404_v55 }
  0xd5   : > { %v429_v58 = vpop.permute.xlu0 %428 }
  0xd6   : > { %v435_v60 = vmul.f32 %v431_v33, %v429_v58  ;;  %v414_v61 = vadd.f32 %v410_v57, %v389_v56 }
  0xd8   : > { %v1485_v63 = vadd.f32 %v435_v60, %v414_v61 }
  0xdb   : > { %443 = sbr.rel (%p854_p11) target bundleno = 230 (0xe6), region = 52 }
  0xdc   : > { %v421_v3 = vpop.permute.xlu1 %420 }
  0xdd   : > { %v433_v6 = vmul.f32 %v431_v33, %v421_v3 }
  0xdf   : > { %v1487_v10 = vadd.f32 %v433_v6, %v412_v5 }
  0xe0   : > { %444 = vst [vmem:[%s1490_s12] sm:$0x3f] %v1431_v1  ;;  %v1246_v11 = vmov 0.0  }
  0xe1   : > { %445 = vst [vmem:[%s1490_s12 + $0x6] sm:$0x3] %v1246_v11 }
  0xe2   : > { %446 = vst [vmem:[%s1490_s12 + $0x8] sm:$0xff] %v1481_v52 }
  0xe3   : > { %447 = vst [vmem:[%s1490_s12 + $0x10] sm:$0xff] %v1487_v10 }
  0xe4   : > { %448 = vst [vmem:[%s1490_s12 + $0x18] sm:$0xff] %v1483_v53 }
  0xe5   : > { %449 = vst [vmem:[%s1490_s12 + $0x20] sm:$0xff] %v1485_v63 }
  0xe6 PF: > { %p855_p12 = scmp.le.s32.totalorder %s1221_s24, 0 }
  0xe8   : > { %453 = sbr.rel (%p855_p12) target bundleno = 447 (0x1bf), region = 56 }
  0xed   : > { %569 = vmatpush.msra.mxu0 %v1485_v63  ;;  %867 = vmatpush.msra.mxu2 %v1485_v63  ;;  %v1508_v12 = vld [vmem:[%s1490_s12 + $0x20] sm:$0xff]  ;;  %v1247_v13 = vmov 1   ;;  %v1512_v14 = vld [vmem:[%s1490_s12 + $0x18] sm:$0xff]  ;;  %v1520_v15 = vld [vmem:[%s1490_s12 + $0x10] sm:$0xff]  ;;  %vm544_vm0 = vcmask 261120   ;;  %v1248_v19 = vmov 2   ;;  %v459_v24 = vmul.f32 %v1431_v1, %v1431_v1 }
  0xee   : > { %1016 = vset.pattern.permute.xlu0 %v1247_v13  ;;  %615 = vmatpush.msra.mxu1 %v1508_v12  ;;  %v499_v16 = vld [vmem:[#allocation5] sm:$0xff]  ;;  %v501_v17 = vld [vmem:[#allocation5 + $0x10] sm:$0xff]  ;;  %v500_v20 = vld [vmem:[#allocation5 + $0x8] sm:$0xff]  ;;  %v1249_v22 = vmov 3  }
  0xef   : > { %871 = vmatpush.msra.mxu3 %v1508_v12  ;;  %570 = vmatpush.msra.mxu0 %v1483_v53  ;;  %v1529_v18 = vld [vmem:[%s1490_s12 + $0x8] sm:$0xff]  ;;  %v502_v21 = vld [vmem:[#allocation5 + $0x18] sm:$0xff]  ;;  %v1554_v23 = vld [vmem:[%s1490_s12] sm:$0xff]  ;;  %v461_v26 = vrot.slane %v459_v24, 1 }
  0xf0   : > { %868 = vmatpush.msra.mxu2 %v1483_v53  ;;  %504 = vperm.xlu0 %1016, %v1442_v4   ;;  %v479_v25 = vmul.f32 %v1554_v23, %v1554_v23 }
  0xf1   : > { %1017 = vset.pattern.permute.xlu1 %v1247_v13  ;;  %616 = vmatpush.msra.mxu1 %v1512_v14  ;;  %v463_v28 = vadd.f32 %v461_v26, %v459_v24 }
  0xf2   : > { %872 = vmatpush.msra.mxu3 %v1512_v14  ;;  %571 = vmatpush.msra.mxu0 %v1487_v10  ;;  %v481_v27 = vrot.slane %v479_v25, 1  ;;  %v484_v30 = vrot.slane %v479_v25, 2 }
  0xf3   : > { %869 = vmatpush.msra.mxu2 %v1487_v10  ;;  %512 = vperm.xlu1 %1017, %v1465_v9  }
  0xf4   : > { %617 = vmatpush.msra.mxu1 %v1520_v15  ;;  %873 = vmatpush.msra.mxu3 %v1520_v15  ;;  %v483_v29 = vadd.f32 %v481_v27, %v479_v25 }
  0xf5   : > { %572 = vmatpush.msra.mxu0 %v1481_v52  ;;  %870 = vmatpush.msra.mxu2 %v1481_v52 }
  0xf6   : > { %856 = vmatmul.msk.f32.vlgmr.msra.gmra.mxu0 %vm544_vm0, %v499_v16  ;;  %858 = vmatmul.msk.f32.vlgmr.msra.gmra.mxu2 %vm544_vm0, %v501_v17 }
  0xf7   : > { %618 = vmatpush.msra.mxu1 %v1529_v18  ;;  %874 = vmatpush.msra.mxu3 %v1529_v18 }
  0xf8   : > { %860 = vmatmul.msk.f32.vlgmr.msra.gmra.mxu1 %vm544_vm0, %v499_v16  ;;  %862 = vmatmul.msk.f32.vlgmr.msra.gmra.mxu3 %vm544_vm0, %v501_v17 }
  0xf9   : > { %508 = vperm.xlu0 %1016, %v1454_v7   ;;  %1019 = vset.pattern.permute.xlu2 %v1248_v19 }
  0xfa   : > { %529 = vperm.xlu2 %1019, %v1454_v7  }
  0xfb   : > { %1018 = vset.pattern.permute.xlu1 %v1248_v19 }
  0xfc   : > { %525 = vperm.xlu1 %1018, %v1442_v4  }
  0xfe   : > { %857 = vmatmul.msk.f32.gmra.mxu0 %vm544_vm0, %v500_v20  ;;  %859 = vmatmul.msk.f32.gmra.mxu2 %vm544_vm0, %v502_v21 }
 0x100   : > { %861 = vmatmul.msk.f32.gmra.mxu1 %vm544_vm0, %v500_v20  ;;  %863 = vmatmul.msk.f32.gmra.mxu3 %vm544_vm0, %v502_v21 }
 0x101   : > { %1021 = vset.pattern.permute.xlu0 %v1248_v19 }
 0x102   : > { %533 = vperm.xlu0 %1021, %v1465_v9   ;;  %1020 = vset.pattern.permute.xlu2 %v1247_v13 }
 0x103   : > { %516 = vperm.xlu2 %1020, %v1460_v8  }
 0x104   : > { %537 = vperm.xlu1 %1018, %v1460_v8  }
 0x10a   : > { %1024 = vset.pattern.permute.xlu0 %v1249_v22 }
 0x10b   : > { %653 = vperm.xlu0 %1024, %v1460_v8   ;;  %1022 = vset.pattern.permute.xlu2 %v1249_v22  ;;  %v464_v8 = vrot.slane %v459_v24, 2 }
 0x10c   : > { %1023 = vset.pattern.permute.xlu1 %v1249_v22  ;;  %641 = vperm.xlu2 %1022, %v1442_v4   ;;  %v486_v4 = vadd.f32 %v484_v30, %v483_v29 }
 0x10d   : > { %645 = vperm.xlu1 %1023, %v1454_v7   ;;  %v466_v31 = vadd.f32 %v464_v8, %v463_v28 }
 0x10e   : > { %vm494_vm2 = vcmp.eq.f32.partialorder %v486_v4, inf  ;;  %v497_v48 = vand.u32 2147483648, %v486_v4  ;;  %vm496_vm4 = vcmp.eq.f32.partialorder %v486_v4, 0.0 }
 0x10f   : > { %1025 = vrsqrt.f32 %v466_v31  ;;  %vm474_vm1 = vcmp.eq.f32.partialorder %v466_v31, inf  ;;  %v477_v46 = vand.u32 2147483648, %v466_v31  ;;  %vm476_vm3 = vcmp.eq.f32.partialorder %v466_v31, 0.0 }
 0x110   : > { %1027 = vrsqrt.f32 %v486_v4 }
 0x114   : > { %649 = vperm.xlu2 %1022, %v1465_v9  }
 0x115   : > { %v1026_v7 = vpop.eup %1025 }
 0x116   : > { %v1028_v9 = vpop.eup %1027  ;;  %v468_v32 = vmul.f32 %v1026_v7, %v466_v31 }
 0x117   : > { %v488_v33 = vmul.f32 %v1028_v9, %v486_v4 }
 0x118   : > { %v469_v34 = vmul.f32 %v1026_v7, %v468_v32 }
 0x119   : > { %v489_v35 = vmul.f32 %v1028_v9, %v488_v33 }
 0x11a   : > { %v470_v36 = vmul.f32 0.5, %v469_v34 }
 0x11b   : > { %v490_v37 = vmul.f32 0.5, %v489_v35 }
 0x11c   : > { %v471_v38 = vsub.f32 1.5, %v470_v36 }
 0x11d   : > { %v491_v39 = vsub.f32 1.5, %v490_v37 }
 0x11e   : > { %v472_v40 = vmul.f32 %v1026_v7, %v471_v38 }
 0x11f   : > { %v492_v41 = vmul.f32 %v1028_v9, %v491_v39 }
 0x120   : > { %v473_v43 = vmul.f32 %v472_v40, %v466_v31 }
 0x121   : > { %v493_v44 = vmul.f32 %v492_v41, %v486_v4 }
 0x122   : > { %v475_v47 = vsel %vm474_vm1, %v466_v31, %v473_v43 }
 0x123   : > { %v495_v50 = vsel %vm494_vm2, %v486_v4, %v493_v44  ;;  %v478_v51 = vsel %vm476_vm3, %v477_v46, %v475_v47 }
 0x124   : > { %v498_v55 = vsel %vm496_vm4, %v497_v48, %v495_v50  ;;  %v519_v56 = vperm.slane %v478_v51, 3 }
 0x125   : > { %v594_v57 = vperm.slane %v498_v55, 3 }
 0x154   : > { %v530_v49 = vpop.permute.xlu2 %529 }
 0x15d   : > { %v517_v60 = vpop.permute.xlu2 %516 }
 0x15e   : > { %v523_v26 = vmul.f32 %v519_v56, %v517_v60  ;;  %v598_v7 = vmul.f32 %v594_v57, %v517_v60 }
 0x162   : > { %v505_v42 = vpop.permute.xlu0 %504 }
 0x163   : > { %v520_v59 = vmul.f32 %v519_v56, %v505_v42  ;;  %v595_v61 = vmul.f32 %v594_v57, %v505_v42 }
 0x165   : > { %v513_v45 = vpop.permute.xlu1 %512 }
 0x166   : > { %v522_v3 = vmul.f32 %v519_v56, %v513_v45  ;;  %v597_v21 = vmul.f32 %v594_v57, %v513_v45  ;;  %v642_v29 = vpop.permute.xlu2 %641 }
 0x16b   : > { %v509_v54 = vpop.permute.xlu0 %508 }
 0x16c   : > { %v521_v5 = vmul.f32 %v519_v56, %v509_v54  ;;  %v596_v13 = vmul.f32 %v594_v57, %v509_v54 }
 0x16e   : > { %v526_v58 = vpop.permute.xlu1 %525  ;;  %v541_v25 = vadd.f32 %v530_v49, %v521_v5  ;;  %v600_v31 = vadd.f32 %v596_v13, %v530_v49  ;;  %v650_v46 = vpop.permute.xlu2 %649 }
 0x16f   : > { %v540_v6 = vadd.f32 %v526_v58, %v520_v59  ;;  %v599_v11 = vadd.f32 %v595_v61, %v526_v58 }
 0x173   : > { %v574_v62 = vpop.f32.mrf.mxu0 }
 0x174   : > { %v534_v0 = vpop.permute.xlu0 %533  ;;  %v586_v16 = vadd.f32 %v574_v62, %v540_v6 }
 0x175   : > { %v620_v2 = vpop.f32.mrf.mxu1  ;;  %v542_v17 = vadd.f32 %v534_v0, %v522_v3  ;;  %v601_v8 = vadd.f32 %v597_v21, %v534_v0 }
 0x176   : > { %v632_v19 = vadd.f32 %v620_v2, %v599_v11  ;;  %v538_v22 = vpop.permute.xlu1 %537  ;;  %1029 = vtanh.f32 %v586_v16 }
 0x177   : > { %v543_v33 = vadd.f32 %v538_v22, %v523_v26  ;;  %v602_v36 = vadd.f32 %v598_v7, %v538_v22 }
 0x178   : > { %1031 = vtanh.f32 %v632_v19 }
 0x179   : > { %v580_v20 = vpop.f32.mrf.mxu2 }
 0x17a   : > { %v588_v24 = vadd.f32 %v580_v20, %v542_v17 }
 0x17b   : > { %v626_v27 = vpop.f32.mrf.mxu3  ;;  %v577_v28 = vpop.f32.mrf.mxu0 }
 0x17c   : > { %v587_v30 = vadd.f32 %v577_v28, %v541_v25  ;;  %1033 = vtanh.f32 %v588_v24  ;;  %v634_v9 = vadd.f32 %v626_v27, %v601_v8  ;;  %v1030_v35 = vpop.eup %1029 }
 0x17d   : > { %v623_v4 = vpop.f32.mrf.mxu1  ;;  %v656_v45 = vmul.f32 %v1030_v35, %v642_v29  ;;  %v654_v54 = vpop.permute.xlu0 %653 }
 0x17e   : > { %v633_v32 = vadd.f32 %v623_v4, %v600_v31  ;;  %1035 = vtanh.f32 %v587_v30  ;;  %v1032_v38 = vpop.eup %1031 }
 0x17f   : > { %v646_v40 = vpop.permute.xlu1 %645  ;;  %v669_v48 = vmul.f32 %v1032_v38, %v642_v29 }
 0x180   : > { %1037 = vtanh.f32 %v633_v32 }
 0x181   : > { %v583_v34 = vpop.f32.mrf.mxu2  ;;  %1039 = vtanh.f32 %v634_v9 }
 0x182   : > { %v589_v37 = vadd.f32 %v583_v34, %v543_v33  ;;  %v1034_v41 = vpop.eup %1033 }
 0x183   : > { %v629_v39 = vpop.f32.mrf.mxu3  ;;  %v658_v55 = vmul.f32 %v1034_v41, %v650_v46 }
 0x184   : > { %1041 = vtanh.f32 %v589_v37  ;;  %v635_v42 = vadd.f32 %v629_v39, %v602_v36  ;;  %v1036_v43 = vpop.eup %1035 }
 0x185   : > { %v657_v47 = vmul.f32 %v1036_v43, %v646_v40 }
 0x186   : > { %v1038_v44 = vpop.eup %1037  ;;  %1043 = vtanh.f32 %v635_v42 }
 0x187   : > { %v670_v49 = vmul.f32 %v1038_v44, %v646_v40  ;;  %v1040_v50 = vpop.eup %1039  ;;  %v660_v51 = vadd.f32 %v657_v47, %v656_v45 }
 0x188   : > { %v671_v58 = vmul.f32 %v1040_v50, %v650_v46 }
 0x189   : > { %v673_v56 = vadd.f32 %v670_v49, %v669_v48  ;;  %v661_v60 = vadd.f32 %v660_v51, %v658_v55 }
 0x18a   : > { %v1042_v57 = vpop.eup %1041 }
 0x18b   : > { %v659_v59 = vmul.f32 %v1042_v57, %v654_v54  ;;  %v674_v2 = vadd.f32 %v673_v56, %v671_v58 }
 0x18c   : > { %v1044_v61 = vpop.eup %1043 }
 0x18d   : > { %v662_v62 = vadd.f32 %v661_v60, %v659_v59  ;;  %v672_v0 = vmul.f32 %v1044_v61, %v654_v54 }
 0x18f   : > { %v663_v3 = vrot.slane %v662_v62, 4  ;;  %v675_v5 = vadd.f32 %v674_v2, %v672_v0 }
 0x191   : > { %v664_v6 = vadd.f32 %v663_v3, %v662_v62  ;;  %v676_v11 = vrot.slane %v675_v5, 4 }
 0x193   : > { %v665_v13 = vrot.slane %v664_v6, 2  ;;  %v677_v16 = vadd.f32 %v676_v11, %v675_v5 }
 0x195   : > { %v666_v17 = vadd.f32 %v665_v13, %v664_v6  ;;  %v678_v19 = vrot.slane %v677_v16, 2 }
 0x197   : > { %v667_v20 = vrot.slane %v666_v17, 1  ;;  %v679_v21 = vadd.f32 %v678_v19, %v677_v16 }
 0x199   : > { %v668_v22 = vadd.f32 %v667_v20, %v666_v17  ;;  %v680_v24 = vrot.slane %v679_v21, 1 }
 0x19b   : > { %v681_v25 = vadd.f32 %v680_v24, %v679_v21 }
 0x19d   : > { %v682_v26 = vmax.f32 %v668_v22, %v681_v25 }
 0x19f   : > { %v683_v27 = vsub.f32 %v668_v22, %v682_v26  ;;  %v686_v28 = vsub.f32 %v681_v25, %v682_v26 }
 0x1a1   : > { %v684_v8 = vmul.f32 1.442695, %v683_v27  ;;  %v687_v29 = vmul.f32 1.442695, %v686_v28 }
 0x1a3   : > { %1045 = vpow2.f32 %v684_v8 }
 0x1a4   : > { %1047 = vpow2.f32 %v687_v29 }
 0x1a9   : > { %v1046_v30 = vpop.eup %1045 }
 0x1aa   : > { %v1048_v31 = vpop.eup %1047 }
 0x1ab   : > { %v689_v4 = vadd.f32 %v1048_v31, %v1046_v30 }
 0x1ad   : > { %1049 = vrcp.f32 %v689_v4 }
 0x1b3   : > { %v1050_v7 = vpop.eup %1049 }
 0x1b4   : > { %v691_v9 = vmul.f32 %v1050_v7, %v1046_v30  ;;  %v692_v32 = vmul.f32 %v1050_v7, %v1048_v31 }
 0x1b6   : > { %v693_v33 = vmul.f32 %v691_v9, %v1431_v1  ;;  %v694_v34 = vmul.f32 %v692_v32, %v1554_v23  ;;  %v698_v35 = vmul.f32 %v691_v9, %v1481_v52  ;;  %v699_v36 = vmul.f32 %v691_v9, %v1487_v10 }
 0x1b7   : > { %v700_v37 = vmul.f32 %v691_v9, %v1483_v53  ;;  %v701_v38 = vmul.f32 %v691_v9, %v1485_v63  ;;  %v702_v39 = vmul.f32 %v692_v32, %v1529_v18  ;;  %v703_v40 = vmul.f32 %v692_v32, %v1520_v15 }
 0x1b8   : > { %v695_v41 = vadd.f32 %v694_v34, %v693_v33  ;;  %v704_v1 = vmul.f32 %v692_v32, %v1512_v14  ;;  %v705_v23 = vmul.f32 %v692_v32, %v1508_v12 }
 0x1b9   : > { %v706_v42 = vadd.f32 %v702_v39, %v698_v35  ;;  %v707_v43 = vadd.f32 %v703_v40, %v699_v36 }
 0x1ba   : > { %696 = vst [vmem:[%s1490_s12] sm:$0x3f] %v695_v41   ;;  %v708_v52 = vadd.f32 %v704_v1, %v700_v37  ;;  %v709_v44 = vadd.f32 %v705_v23, %v701_v38 }
 0x1bb   : > { %710 = vst [vmem:[%s1490_s12 + $0x8] sm:$0xff] %v706_v42 }
 0x1bc   : > { %711 = vst [vmem:[%s1490_s12 + $0x10] sm:$0xff] %v707_v43 }
 0x1bd   : > { %712 = vst [vmem:[%s1490_s12 + $0x18] sm:$0xff] %v708_v52 }
 0x1be   : > { %713 = vst [vmem:[%s1490_s12 + $0x20] sm:$0xff] %v709_v44 }
 0x1bf PF: > { %s864_s21 = sshll.u32 %s1225_s25, 3  ;;  %s1659_s5 = sld [smem:[#allocation18_spill]] }
 0x1c0   : > { %s726_s6 = sshll.u32 %s1490_s12, 4  ;;  %s715_s10 = scalar_lea.sflag [#allocation4], %s295_s18  ;;  %s727_s6 = int_to_ptr.vmem [resolvable:$true] %s726_s6 }
 0x1c5   : > { %s725_s29 = scalar_lea.hbm %s1659_s5, %s864_s21  ;;  %s1131_s25 = scalar_lea.hbm %s1659_s5, 200 }
 0x1c6   : > { %s728_s20 = sshll.u32 %s725_s29, 4  ;;  %s729_s20 = int_to_ptr.hbm [resolvable:$true] %s728_s20 }
 0x1c7   : > { %s1125_s16 = sshra.s32 %s729_s20, 4  ;;  %s1126_s16 = int_to_ptr.hbm [resolvable:$true] %s1125_s16 }
 0x1c8   : > { %s1127_s8 = scalar_lea.hbm %s1126_s16, 40  ;;  %p1132_p5 = scmp.lt.s32.totalorder %s1126_s16, %s1659_s5 }
 0x1c9   : > { %p1128_p13 = scmp.ne.s32.totalorder %s1126_s16, %s1127_s8  ;;  %p1133_p6 = scmp.lt.s32.totalorder %s1131_s25, %s1127_s8 }
 0x1cb   : > { %p1129_p0 = pnand %p1128_p13, %p1395_p7  ;;  %p1134_p8 = por %p1133_p6, %p1132_p5 }
 0x1cd   : > { %p1130_p3 = pneg %p1129_p0 }
 0x1cf   : > { %p1135_p9 = pnand %p1134_p8, %p1130_p3 }
 0x1d1   : > { %1138 = shalt.err (!%p1135_p9)
}
 0x1d2   : > { %s1250_s18 = smov 128   ;;  %s1251_s7 = smov 640  }
 0x1d3   : > { %s1252_s12 = smov 8  }
 0x1d4   : > { %884 = dma.vmem_to_hbm [thread:$0]  (%p1395_p7), %s727_s6, 640, %s729_s20, %s715_s10, %s1250_s18, %s1251_s7, %s1252_s12  }
 0x1d5 PF: > { %s1660_s21 = sld [smem:[#allocation11_spill]]  ;;  %p901_p2 = scmp.ge.s32.totalorder %s1237_s28, 2 }
 0x1d7   : > { %p895_p1 = pnand %p901_p2, %p1408_p10 }
 0x1d9   : > { %p896_p4 = pneg %p895_p1 }
 0x1db   : > { %s743_s9 = sand.u32 1, %s1660_s21  }
 0x1dc   : > { %s744_s15 = scalar_lea.sflag [#allocation4], %s743_s9 }
 0x1dd   : > { %1192 = dma.done.wait (%p896_p4), %s744_s15, 640  }
 0x1de   : > { %1194 = vsyncadd (%p896_p4), %s744_s15, 4294966656  ;;  %s22_s28 = sadd.s32 1, %s1237_s28   ;;  %s1661_s29 = sld [smem:[#allocation12_spill]] }
 0x1df   : > { %p19_p11 = scmp.ge.s32.totalorder %s22_s28, 17   ;;  %s1662_s20 = sld [smem:[#allocation16_spill]] }
 0x1e0   : > { %s1663_s6 = sld [smem:[#allocation13_spill]]  ;;  %s1665_s18 = smov %s1201_s19 }
 0x1e1   : > { %s1664_s10 = sld [smem:[#allocation14_spill]]  ;;  %s1667_s21 = smov %s1213_s22 }
 0x1e2   : > { %s1668_s22 = smov %s1217_s23  ;;  %s1669_s23 = smov %s1403_s3 }
 0x1e3   : > { %s1670_s24 = smov %s1229_s26  ;;  %s1671_s25 = smov %s1233_s27 }
 0x1e4   : > { %s1666_s19 = smov %s1661_s29  ;;  %21 = sbr.rel (!%p19_p11) target bundleno = 13 (0xd), region = 100 }
 0x1e6   : > { %s1672_s26 = smov %s1663_s6 }
 0x1e7   : > { %s1673_s27 = smov %s1664_s10 }
 0x1e9   :  { %750 = vsyncpa [#allocation3], 1 }
 0x1ea   :  { %752 = vsyncpa [#allocation3 + $0x1], 1 }
 0x1eb   :  { %753 = vsyncpa [#allocation6], 1 }
 0x1ec   :  { %754 = vsyncpa [#allocation4], 1 }
 0x1ed   :  { %756 = vsyncpa [#allocation4 + $0x1], 1 }

</bundles_post_ra>
